<compile_context>
chip_gen: v5e
topology: v5e:2x2
jax: 0.10.0
libtpu: 0.0.40
codegen_flags: <defaults>
</compile_context>

<pallas_src>
import math

import numpy as np
import jax
import jax.numpy as jnp
from jax.experimental import pallas as pl
from jax.experimental.pallas import tpu as pltpu

# ----------------------- TorchGate configuration (small demo sizes) ----------------
SR = 8000
N_FFT = 64                      # scaled-down STFT so the demo stays small
WIN_LENGTH = N_FFT
HOP = WIN_LENGTH // 4           # 16
F_BINS = N_FFT // 2 + 1         # 33 (onesided)
N_STD_THRESH = 1.5              # n_std_thresh_stationary
PROP_DECREASE = 1.0
TOP_DB = 40.0                   # amp_to_db top_db
AMP_EPS = float(np.finfo(np.float64).eps)
POW_EPS = AMP_EPS * AMP_EPS                 # eps on |X|^2 (log-of-power formulation)
DB_POW_SCALE = 10.0 / math.log(10.0)        # 10*log10(p) == 20*log10(|X|)
FREQ_MASK_SMOOTH_HZ = 500.0
TIME_MASK_SMOOTH_MS = 50.0

# Lane/sublane-aligned padded sizes used inside the kernel.
NP_FRAME = 128                  # padded output-frame width (lane-dense store, IDFT N)
HALF = 64                       # per-half lane width holding the 33 onesided bins
FULL = 2 * HALF                 # fused [real | imag] width = 128
assert F_BINS <= HALF and N_FFT <= NP_FRAME and N_FFT % 8 == 0


# ----------------------------- parameter construction ------------------------------
def _triangle(n: int) -> np.ndarray:
    # cat(linspace(0,1,n+1,endpoint=False), linspace(1,0,n+2))[1:-1]  (length 2n+1)
    a = np.linspace(0.0, 1.0, n + 1, endpoint=False)
    b = np.linspace(1.0, 0.0, n + 2)
    return np.concatenate([a, b])[1:-1]


def _toeplitz(v: np.ndarray, size: int) -> np.ndarray:
    # M[i, j] = v[j - i + pad] for |j - i| <= pad else 0  ("same" zero padding)
    pad = (len(v) - 1) // 2
    i = np.arange(size)[:, None]
    j = np.arange(size)[None, :]
    d = j - i + pad
    valid = (d >= 0) & (d < len(v))
    return np.where(valid, v[np.clip(d, 0, len(v) - 1)], 0.0).astype(np.float32)


def build_params(num_frames: int):
    """Returns (kernel_params, ref_params, t_pad)."""
    n = np.arange(N_FFT, dtype=np.float64)
    f = np.arange(F_BINS, dtype=np.float64)

    # periodic Hann window (torch.hann_window default)
    win = 0.5 * (1.0 - np.cos(2.0 * np.pi * np.arange(WIN_LENGTH) / WIN_LENGTH))

    # forward real-DFT matrices: X = frames @ dft_cos  - 1j * frames @ dft_sin
    ang = 2.0 * np.pi * np.outer(n, f) / N_FFT
    dft_cos = np.cos(ang)                                          # (N, F)
    dft_sin = np.sin(ang)                                          # (N, F)

    # inverse real-DFT matrices (onesided -> real frame, torch.istft's irfft)
    wgt = np.ones(F_BINS, dtype=np.float64)
    wgt[1:F_BINS - 1] = 2.0
    ang2 = 2.0 * np.pi * np.outer(f, n) / N_FFT
    idft_cos = wgt[:, None] * np.cos(ang2) / N_FFT                 # (F, N)
    idft_sin = -wgt[:, None] * np.sin(ang2) / N_FFT                # (F, N)

    # smoothing filter = outer(v_f, v_t) / sum (module's _generate_mask_smoothing_filter)
    n_grad_freq = int(FREQ_MASK_SMOOTH_HZ / (SR / (N_FFT / 2)))
    n_grad_time = int(TIME_MASK_SMOOTH_MS / (HOP / SR * 1000))
    assert n_grad_freq >= 1 and n_grad_time >= 1
    v_f = _triangle(n_grad_freq)
    v_t = _triangle(n_grad_time)
    filt_sum = float(v_f.sum() * v_t.sum())
    mt = _toeplitz(v_t, num_frames) / np.float32(filt_sum)         # (T, T), 1/sum folded in
    mf = _toeplitz(v_f, F_BINS)                                    # (F, F), symmetric

    t_pad = -(-num_frames // 8) * 8                                # round T up to sublane mult

    # ---- fused, lane-padded kernel constants (windows folded in) ----
    # forward: Z = frames @ dcs, Z[:, :HALF]=Re(X), Z[:, HALF:]=Im(X); frames are
    # exactly N_FFT samples wide so no lane padding on the contraction dim.
    dcs = np.zeros((N_FFT, FULL), np.float32)
    dcs[:, :F_BINS] = win[:, None] * dft_cos
    dcs[:, HALF:HALF + F_BINS] = -(win[:, None] * dft_sin)
    # inverse: frames_out = [Yr | Yi] @ dinv, synthesis window folded into the columns
    dinv = np.zeros((FULL, NP_FRAME), np.float32)
    dinv[:F_BINS, :N_FFT] = idft_cos * win[None, :]
    dinv[HALF:HALF + F_BINS, :N_FFT] = idft_sin * win[None, :]
    # time Toeplitz padded to (t_pad, t_pad): padded rows/cols are zero (no leakage)
    mt_pad = np.zeros((t_pad, t_pad), np.float32)
    mt_pad[:num_frames, :num_frames] = mt
    # frequency Toeplitz duplicated to both halves: (HALF, FULL)
    mfd = np.zeros((HALF, FULL), np.float32)
    mfd[:F_BINS, :F_BINS] = mf
    mfd[:F_BINS, HALF:HALF + F_BINS] = mf

    kernel_params = tuple(jnp.asarray(a, jnp.float32) for a in (dcs, mt_pad, mfd, dinv))
    ref_params = tuple(jnp.asarray(a, jnp.float32)
                       for a in (win, dft_cos, dft_sin, mt, mf, idft_cos, idft_sin))
    return kernel_params, ref_params, t_pad


# ----------------------------------- Pallas kernel ----------------------------------
def make_gate_kernel(t_valid: int, t_pad: int):
    inv_t = float(1.0 / t_valid)
    inv_tm1 = float(1.0 / (t_valid - 1))

    def kernel(frames_ref, dcs_ref, mt_ref, mfd_ref, dinv_ref, out_ref):
        frames = frames_ref[0]                                        # (TP, 64) raw frames
        # fused windowed real DFT (single MXU matmul): z = [Re(X) | Im(X)]
        z = jnp.dot(frames, dcs_ref[...], preferred_element_type=jnp.float32)   # (TP, 128)

        zsq = z * z
        power = zsq[:, :HALF] + zsq[:, HALF:]                         # |X|^2, (TP, 64)
        x_db = DB_POW_SCALE * jnp.log(power + POW_EPS)                # amp_to_db (log of power)

        # valid-frame mask: rows >= t_valid are zero padding, excluded from statistics
        valid = jax.lax.broadcasted_iota(jnp.int32, (t_pad, HALF), 0) < t_valid
        col_max = jnp.max(jnp.where(valid, x_db, jnp.float32(-3.0e38)),
                          axis=0, keepdims=True)
        x_db = jnp.maximum(x_db, col_max - TOP_DB)                    # top_db clamp

        # stationary noise threshold: mean + n_std * unbiased std over (valid) time frames
        mean = jnp.sum(jnp.where(valid, x_db, 0.0), axis=0, keepdims=True) * inv_t
        dev = jnp.where(valid, x_db - mean, 0.0)
        var = jnp.sum(dev * dev, axis=0, keepdims=True) * inv_tm1
        thresh = mean + N_STD_THRESH * jnp.sqrt(var)
        sig = jnp.where(x_db > thresh, 1.0, 0.0)
        sig = PROP_DECREASE * (sig - 1.0) + 1.0

        # "same" separable triangular smoothing as two Toeplitz matmuls; the duplicated
        # mfd writes the smoothed mask into both the real and imag halves directly.
        # TODO(synk): for long audio the dense (TP,TP) time Toeplitz should become banded
        # (width 2*n_grad_time+1) so VMEM scales O(T*band) instead of O(T^2).
        sm = jnp.dot(jnp.dot(mt_ref[...], sig, preferred_element_type=jnp.float32),
                     mfd_ref[...], preferred_element_type=jnp.float32)           # (TP, 128)

        # gate the complex spectrogram, fused inverse real DFT (synthesis window folded)
        out_ref[0] = jnp.dot(z * sm, dinv_ref[...], preferred_element_type=jnp.float32)

    return kernel


def torch_gate_pallas(frames_padded, dcs, mt_pad, mfd, dinv, t_valid):
    B, t_pad, nfr = frames_padded.shape
    assert nfr == N_FFT
    kernel = make_gate_kernel(t_valid, t_pad)
    grid_spec = pltpu.PrefetchScalarGridSpec(
        num_scalar_prefetch=0,
        grid=(B,),
        in_specs=[
            pl.BlockSpec((1, t_pad, N_FFT), lambda b: (b, 0, 0)),  # frames, one batch / step
            pl.BlockSpec((N_FFT, FULL), lambda b: (0, 0)),         # fused windowed DFT
            pl.BlockSpec((t_pad, t_pad), lambda b: (0, 0)),        # time Toeplitz (1/sum folded)
            pl.BlockSpec((HALF, FULL), lambda b: (0, 0)),          # duplicated freq Toeplitz
            pl.BlockSpec((FULL, NP_FRAME), lambda b: (0, 0)),      # fused windowed inverse DFT
        ],
        out_specs=pl.BlockSpec((1, t_pad, NP_FRAME), lambda b: (b, 0, 0)),
    )
    return pl.pallas_call(
        kernel,
        out_shape=jax.ShapeDtypeStruct((B, t_pad, NP_FRAME), jnp.float32),
        grid_spec=grid_spec,
        compiler_params=pltpu.CompilerParams(dimension_semantics=("parallel",)),
    )(frames_padded, dcs, mt_pad, mfd, dinv)


# ----------------------------------- JAX glue ---------------------------------------
def frame_signal(x):
    # torch.stft(center=True, pad_mode='constant'): zero-pad n_fft//2 each side.
    B, L = x.shape
    pad = N_FFT // 2
    xp = jnp.pad(x, ((0, 0), (pad, pad)))
    T = (L + 2 * pad - N_FFT) // HOP + 1
    idx = np.arange(T)[:, None] * HOP + np.arange(N_FFT)[None, :]
    return xp[:, idx], T                                    # (B, T, N)


def pad_frames(frames, t_pad):
    B, T, N = frames.shape
    return jnp.pad(frames, ((0, 0), (0, t_pad - T), (0, 0)))


def finish_istft(yframes, window, T):
    # overlap-add + window-envelope normalization + center trim (torch.istft)
    B = yframes.shape[0]
    full_len = N_FFT + HOP * (T - 1)
    idx = (np.arange(T)[:, None] * HOP + np.arange(N_FFT)[None, :]).reshape(-1)
    y = jnp.zeros((B, full_len), yframes.dtype).at[:, idx].add(yframes.reshape(B, -1))

    win = np.asarray(window).reshape(-1)
    env = np.zeros(full_len, np.float32)
    np.add.at(env, idx, np.tile(win * win, T))
    start = N_FFT // 2
    out_len = HOP * (T - 1)
    env_t = env[start:start + out_len]
    assert env_t.min() > 1e-11                              # NOLA check, as torch.istft
    return y[:, start:start + out_len] / jnp.asarray(env_t)[None, :]


def torch_gate_forward(x, kernel_params, window, t_pad):
    assert x.ndim == 2 and x.shape[-1] >= 2 * WIN_LENGTH
    dcs, mt_pad, mfd, dinv = kernel_params
    frames, T = frame_signal(x)
    fp = pad_frames(frames, t_pad)
    out = torch_gate_pallas(fp, dcs, mt_pad, mfd, dinv, T)
    yframes = out[:, :T, :N_FFT]                            # drop lane/sublane padding
    return finish_istft(yframes, window, T).astype(x.dtype)


# ------------------------- plain-JAX reference (same math) --------------------------
def reference_forward(x, ref_params):
    window, dft_cos, dft_sin, mt, mf, idft_cos, idft_sin = ref_params
    frames, T = frame_signal(x)
    fw = frames * window                                    # (B, T, N)
    xr = jnp.einsum('btn,nf->btf', fw, dft_cos)
    xi = -jnp.einsum('btn,nf->btf', fw, dft_sin)
    power = xr * xr + xi * xi
    x_db = DB_POW_SCALE * jnp.log(power + POW_EPS)
    x_db = jnp.maximum(x_db, jnp.max(x_db, axis=1, keepdims=True) - TOP_DB)
    mean = jnp.mean(x_db, axis=1, keepdims=True)
    var = jnp.sum((x_db - mean) ** 2, axis=1, keepdims=True) / (T - 1)
    thresh = mean + N_STD_THRESH * jnp.sqrt(var)
    sig = jnp.where(x_db > thresh, 1.0, 0.0)
    sig = PROP_DECREASE * (sig - 1.0) + 1.0
    sig = jnp.einsum('tu,buf,fg->btg', mt, sig, mf)
    yr = xr * sig
    yi = xi * sig
    yframes = (jnp.einsum('btf,fn->btn', yr, idft_cos)
               + jnp.einsum('btf,fn->btn', yi, idft_sin)) * window
    return finish_istft(yframes, window, T).astype(x.dtype)


# -------------------------------------- main ----------------------------------------
if __name__ == "__main__":
    key = jax.random.PRNGKey(0)
    B, L = 2, 1024                        # L >= 2*win_length, multiple of hop
    x = jax.random.normal(key, (B, L), dtype=jnp.float32)

    _, num_frames = frame_signal(x)       # single source of truth for the frame count
    kernel_params, ref_params, t_pad = build_params(num_frames)
    window = ref_params[0]

    y = jax.block_until_ready(torch_gate_forward(x, kernel_params, window, t_pad))
    y_ref = jax.block_until_ready(reference_forward(x, ref_params))

    assert y.shape == (B, HOP * (num_frames - 1))
    assert bool(jnp.all(jnp.isfinite(y)))
    max_diff = float(jnp.max(jnp.abs(y - y_ref)))
    assert max_diff < 1e-2, f"Pallas vs reference mismatch: {max_diff}"
    print("KERNEL_OK")
</pallas_src>

<mosaic_0001>
module attributes {stable_mosaic.version = 11 : i64} {
  func.func @kernel(%arg0: i32, %arg1: memref<1x72x64xf32, #tpu.memory_space<vmem>>, %arg2: memref<64x128xf32, #tpu.memory_space<vmem>>, %arg3: memref<72x72xf32, #tpu.memory_space<vmem>>, %arg4: memref<64x128xf32, #tpu.memory_space<vmem>>, %arg5: memref<128x128xf32, #tpu.memory_space<vmem>>, %arg6: memref<1x72x128xf32, #tpu.memory_space<vmem>>) attributes {dimension_semantics = [#tpu.dimension_semantics<parallel>], iteration_bounds = array<i64: 2>, scalar_prefetch = 0 : i64, scratch_operands = 0 : i64, tpu.core_type = #tpu.core_type<tc>, window_params = [{transform_indices = @transform_0, window_bounds = array<i64: 1, 72, 64>}, {pipeline_mode = #tpu.pipeline_mode<synchronous>, transform_indices = @transform_1, window_bounds = array<i64: 64, 128>}, {pipeline_mode = #tpu.pipeline_mode<synchronous>, transform_indices = @transform_2, window_bounds = array<i64: 72, 72>}, {pipeline_mode = #tpu.pipeline_mode<synchronous>, transform_indices = @transform_3, window_bounds = array<i64: 64, 128>}, {pipeline_mode = #tpu.pipeline_mode<synchronous>, transform_indices = @transform_4, window_bounds = array<i64: 128, 128>}, {transform_indices = @transform_5, window_bounds = array<i64: 1, 72, 128>}]} {
    %c0 = arith.constant 0 : index
    %c0_0 = arith.constant 0 : index
    %c0_1 = arith.constant 0 : index
    %0 = vector.load %arg1[%c0, %c0_0, %c0_1] : memref<1x72x64xf32, #tpu.memory_space<vmem>>, vector<1x72x64xf32>
    %1 = vector.shape_cast %0 : vector<1x72x64xf32> to vector<72x64xf32>
    %c0_2 = arith.constant 0 : index
    %c0_3 = arith.constant 0 : index
    %2 = vector.load %arg2[%c0_2, %c0_3] : memref<64x128xf32, #tpu.memory_space<vmem>>, vector<64x128xf32>
    %cst = arith.constant dense<0.000000e+00> : vector<72x128xf32>
    %3 = tpu.matmul %1, %2, %cst {dimension_numbers = #tpu.dot_dimension_numbers<[1], [0], [0], [1], [0, 0, 1, 1], [], []>} : vector<72x64xf32>, vector<64x128xf32>, vector<72x128xf32> -> vector<72x128xf32>
    %4 = arith.mulf %3, %3 : vector<72x128xf32>
    %5 = vector.extract_strided_slice %4 {offsets = [0, 0], sizes = [72, 64], strides = [1, 1]} : vector<72x128xf32> to vector<72x64xf32>
    %6 = vector.extract_strided_slice %4 {offsets = [0, 64], sizes = [72, 64], strides = [1, 1]} : vector<72x128xf32> to vector<72x64xf32>
    %7 = arith.addf %5, %6 : vector<72x64xf32>
    %cst_4 = arith.constant 4.93038066E-32 : f32
    %8 = vector.broadcast %cst_4 : f32 to vector<72x64xf32>
    %9 = arith.addf %7, %8 : vector<72x64xf32>
    %10 = math.log %9 : vector<72x64xf32>
    %cst_5 = arith.constant 4.34294462 : f32
    %11 = vector.broadcast %cst_5 : f32 to vector<72x64xf32>
    %12 = arith.mulf %11, %10 : vector<72x64xf32>
    %13 = tpu.iota {dimensions = array<i32: 0>} : vector<72x64xi32>
    %c65_i32 = arith.constant 65 : i32
    %14 = vector.broadcast %c65_i32 : i32 to vector<72x64xi32>
    %15 = arith.cmpi slt, %13, %14 : vector<72x64xi32>
    %cst_6 = arith.constant -3.000000e+38 : f32
    %16 = vector.broadcast %cst_6 : f32 to vector<72x64xf32>
    %17 = arith.select %15, %12, %16 : vector<72x64xi1>, vector<72x64xf32>
    %cst_7 = arith.constant dense<0xFF800000> : vector<64xf32>
    %18 = vector.multi_reduction <maximumf>, %17, %cst_7 [0] : vector<72x64xf32> to vector<64xf32>
    %19 = vector.shape_cast %18 : vector<64xf32> to vector<1x64xf32>
    %cst_8 = arith.constant 4.000000e+01 : f32
    %20 = vector.broadcast %cst_8 : f32 to vector<1x64xf32>
    %21 = arith.subf %19, %20 : vector<1x64xf32>
    %22 = vector.broadcast %21 : vector<1x64xf32> to vector<72x64xf32>
    %23 = arith.maximumf %12, %22 : vector<72x64xf32>
    %cst_9 = arith.constant 0.000000e+00 : f32
    %24 = vector.broadcast %cst_9 : f32 to vector<72x64xf32>
    %25 = arith.select %15, %23, %24 : vector<72x64xi1>, vector<72x64xf32>
    %cst_10 = arith.constant dense<0.000000e+00> : vector<64xf32>
    %26 = vector.multi_reduction <add>, %25, %cst_10 [0] : vector<72x64xf32> to vector<64xf32>
    %27 = vector.shape_cast %26 : vector<64xf32> to vector<1x64xf32>
    %cst_11 = arith.constant 0.0153846154 : f32
    %28 = vector.broadcast %cst_11 : f32 to vector<1x64xf32>
    %29 = arith.mulf %27, %28 : vector<1x64xf32>
    %30 = vector.broadcast %29 : vector<1x64xf32> to vector<72x64xf32>
    %31 = arith.subf %23, %30 : vector<72x64xf32>
    %cst_12 = arith.constant 0.000000e+00 : f32
    %32 = vector.broadcast %cst_12 : f32 to vector<72x64xf32>
    %33 = arith.select %15, %31, %32 : vector<72x64xi1>, vector<72x64xf32>
    %34 = arith.mulf %33, %33 : vector<72x64xf32>
    %cst_13 = arith.constant dense<0.000000e+00> : vector<64xf32>
    %35 = vector.multi_reduction <add>, %34, %cst_13 [0] : vector<72x64xf32> to vector<64xf32>
    %36 = vector.shape_cast %35 : vector<64xf32> to vector<1x64xf32>
    %cst_14 = arith.constant 1.562500e-02 : f32
    %37 = vector.broadcast %cst_14 : f32 to vector<1x64xf32>
    %38 = arith.mulf %36, %37 : vector<1x64xf32>
    %39 = math.sqrt %38 : vector<1x64xf32>
    %cst_15 = arith.constant 1.500000e+00 : f32
    %40 = vector.broadcast %cst_15 : f32 to vector<1x64xf32>
    %41 = arith.mulf %40, %39 : vector<1x64xf32>
    %42 = arith.addf %29, %41 : vector<1x64xf32>
    %43 = vector.broadcast %42 : vector<1x64xf32> to vector<72x64xf32>
    %44 = arith.cmpf ogt, %23, %43 : vector<72x64xf32>
    %cst_16 = arith.constant 1.000000e+00 : f32
    %cst_17 = arith.constant 0.000000e+00 : f32
    %45 = vector.broadcast %cst_16 : f32 to vector<72x64xf32>
    %46 = vector.broadcast %cst_17 : f32 to vector<72x64xf32>
    %47 = arith.select %44, %45, %46 : vector<72x64xi1>, vector<72x64xf32>
    %cst_18 = arith.constant 1.000000e+00 : f32
    %48 = vector.broadcast %cst_18 : f32 to vector<72x64xf32>
    %49 = arith.subf %47, %48 : vector<72x64xf32>
    %cst_19 = arith.constant 1.000000e+00 : f32
    %50 = vector.broadcast %cst_19 : f32 to vector<72x64xf32>
    %51 = arith.mulf %50, %49 : vector<72x64xf32>
    %cst_20 = arith.constant 1.000000e+00 : f32
    %52 = vector.broadcast %cst_20 : f32 to vector<72x64xf32>
    %53 = arith.addf %51, %52 : vector<72x64xf32>
    %c0_21 = arith.constant 0 : index
    %c0_22 = arith.constant 0 : index
    %54 = vector.load %arg3[%c0_21, %c0_22] : memref<72x72xf32, #tpu.memory_space<vmem>>, vector<72x72xf32>
    %cst_23 = arith.constant dense<0.000000e+00> : vector<72x64xf32>
    %55 = tpu.matmul %54, %53, %cst_23 {dimension_numbers = #tpu.dot_dimension_numbers<[1], [0], [0], [1], [0, 0, 1, 1], [], []>} : vector<72x72xf32>, vector<72x64xf32>, vector<72x64xf32> -> vector<72x64xf32>
    %c0_24 = arith.constant 0 : index
    %c0_25 = arith.constant 0 : index
    %56 = vector.load %arg4[%c0_24, %c0_25] : memref<64x128xf32, #tpu.memory_space<vmem>>, vector<64x128xf32>
    %cst_26 = arith.constant dense<0.000000e+00> : vector<72x128xf32>
    %57 = tpu.matmul %55, %56, %cst_26 {dimension_numbers = #tpu.dot_dimension_numbers<[1], [0], [0], [1], [0, 0, 1, 1], [], []>} : vector<72x64xf32>, vector<64x128xf32>, vector<72x128xf32> -> vector<72x128xf32>
    %58 = arith.mulf %3, %57 : vector<72x128xf32>
    %c0_27 = arith.constant 0 : index
    %c0_28 = arith.constant 0 : index
    %59 = vector.load %arg5[%c0_27, %c0_28] : memref<128x128xf32, #tpu.memory_space<vmem>>, vector<128x128xf32>
    %cst_29 = arith.constant dense<0.000000e+00> : vector<72x128xf32>
    %60 = tpu.matmul %58, %59, %cst_29 {dimension_numbers = #tpu.dot_dimension_numbers<[1], [0], [0], [1], [0, 0, 1, 1], [], []>} : vector<72x128xf32>, vector<128x128xf32>, vector<72x128xf32> -> vector<72x128xf32>
    %c0_30 = arith.constant 0 : index
    %c0_31 = arith.constant 0 : index
    %c0_32 = arith.constant 0 : index
    %61 = vector.load %arg6[%c0_30, %c0_31, %c0_32] : memref<1x72x128xf32, #tpu.memory_space<vmem>>, vector<1x72x128xf32>
    %62 = vector.shape_cast %61 : vector<1x72x128xf32> to vector<72x128xf32>
    %63 = vector.shape_cast %60 : vector<72x128xf32> to vector<1x72x128xf32>
    tpu.vector_store %arg6[%c0_30, %c0_31, %c0_32], %63 {strides = array<i32>} : memref<1x72x128xf32, #tpu.memory_space<vmem>>, vector<1x72x128xf32>,
    return
  }
  func.func @transform_0(%arg0: i32) -> (i32, i32, i32) {
    %c0_i32 = arith.constant 0 : i32
    %c0_i32_0 = arith.constant 0 : i32
    %c0_i32_1 = arith.constant 0 : i32
    return %arg0, %c0_i32, %c0_i32_0 : i32, i32, i32
  }
  func.func @transform_1(%arg0: i32) -> (i32, i32) {
    %c0_i32 = arith.constant 0 : i32
    %c0_i32_0 = arith.constant 0 : i32
    %c0_i32_1 = arith.constant 0 : i32
    return %c0_i32, %c0_i32_0 : i32, i32
  }
  func.func @transform_2(%arg0: i32) -> (i32, i32) {
    %c0_i32 = arith.constant 0 : i32
    %c0_i32_0 = arith.constant 0 : i32
    %c0_i32_1 = arith.constant 0 : i32
    return %c0_i32, %c0_i32_0 : i32, i32
  }
  func.func @transform_3(%arg0: i32) -> (i32, i32) {
    %c0_i32 = arith.constant 0 : i32
    %c0_i32_0 = arith.constant 0 : i32
    %c0_i32_1 = arith.constant 0 : i32
    return %c0_i32, %c0_i32_0 : i32, i32
  }
  func.func @transform_4(%arg0: i32) -> (i32, i32) {
    %c0_i32 = arith.constant 0 : i32
    %c0_i32_0 = arith.constant 0 : i32
    %c0_i32_1 = arith.constant 0 : i32
    return %c0_i32, %c0_i32_0 : i32, i32
  }
  func.func @transform_5(%arg0: i32) -> (i32, i32, i32) {
    %c0_i32 = arith.constant 0 : i32
    %c0_i32_0 = arith.constant 0 : i32
    %c0_i32_1 = arith.constant 0 : i32
    return %arg0, %c0_i32, %c0_i32_0 : i32, i32, i32
  }
}

</mosaic_0001>

<bundles_post_ra>
// kernel: tpu_custom_call.1
= control target key start
LH: loop header
LB: loop body
LE: loop exit
PB: predicated region body
PF: predicated region fallthrough
CT: control target
= control target key end

     0   :  { %10 = vsyncpa [#allocation3], 0  ;;  %s1566_s0 = inlined_call_operand.vmem [shape: f32[2,72,64], index: 0, kind: input, shape index: {}]   ;;  %s1567_s1 = inlined_call_operand.vmem [shape: f32[64,128], index: 1, kind: input, shape index: {}]   ;;  %s1568_s2 = inlined_call_operand.vmem [shape: f32[72,72], index: 2, kind: input, shape index: {}]   ;;  %s1569_s3 = inlined_call_operand.hbm [shape: f32[64,128], index: 3, kind: input, shape index: {}]   ;;  %s1570_s4 = inlined_call_operand.vmem [shape: f32[128,128], index: 4, kind: input, shape index: {}]   ;;  %s1571_s5 = inlined_call_operand.hbm [shape: f32[2,72,128], index: 5, kind: output, shape index: {}]  }
   0x1   :  { %11 = vsyncpa [#allocation4], 0 }
   0x2   :  { %13 = vsyncpa [#allocation4 + $0x1], 0  ;;  %s1219_s18 = smov 0   ;;  %s1221_s19 = smov 0  }
   0x3   :  { %s1223_s20 = smov 0   ;;  %s1225_s21 = smov 0  }
   0x4 LB: > { %s1240_s22 = sadd.s32 4294967295, %s1180_s21   ;;  %s942_s23 = sadd.s32 4294967294, %s1180_s21   ;;  %s1180_s21 = sphi %s1225_s21, %s1577_s21   ;;  %s1176_s20 = sphi %s1223_s20, %s1576_s20   ;;  %s1172_s19 = sphi %s1221_s19, %s1575_s19   ;;  %s1168_s18 = sphi %s1219_s18, %s1574_s18  }
   0x5   : > { %s1244_s24 = sadd.s32 1, %s1180_s21   ;;  %s136_s25 = sadd.s32 1, %s1176_s20 }
   0x6   : > { %s133_s26 = ssub.s32 %s1180_s21, %s1244_s24  ;;  %p146_p0 = scmp.ne.s32.totalorder %s1176_s20, %s1172_s19 }
   0x7   : > { %p134_p1 = scmp.eq.s32.totalorder %s133_s26, 0  ;;  %p147_p2 = scmp.eq.s32.totalorder %s1240_s22, 1 }
   0x8   : > { %p152_p3 = scmp.ne.s32.totalorder %s1172_s19, %s1168_s18  ;;  %p153_p4 = scmp.eq.s32.totalorder %s942_s23, 1 }
   0x9   : > { %s1255_s27 = scalar_select %p134_p1, %s1176_s20, %s136_s25  }
   0xa   : > { %p1257_p5 = por %p147_p2, %p146_p0  ;;  %p1261_p6 = por %p153_p4, %p152_p3 }
   0xb   : > { %p943_p7 = scmp.ge.s32.totalorder %s1180_s21, 1  ;;  %p160_p8 = scmp.lt.s32.totalorder %s1180_s21, 3 }
   0xc   : > { %p1022_p9 = scmp.eq.s32.totalorder %s1240_s22, 0  ;;  %s177_s7 = sshll.u32 %s1569_s3, 4  ;;  %s178_s7 = int_to_ptr.hbm [resolvable:$true] %s177_s7 }
   0xd   : > { %p161_p10 = pnand %p943_p7, %p160_p8  ;;  %s1182_s8 = smov [#allocation2]  }
   0xe   : > { %s179_s9 = sshll.u32 %s1182_s8, 4  ;;  %s1183_s10 = smov 128   ;;  %s180_s9 = int_to_ptr.vmem [resolvable:$true] %s179_s9 }
   0xf   : > { %p1014_p11 = pneg %p161_p10  ;;  %s1184_s11 = smov 8  }
  0x10   : > { %206 = sbr.rel (%p161_p10) target bundleno = 965 (0x3c5), region = 40 }
  0x11   : > { %p1015_p12 = pnand %p1022_p9, %p1014_p11 }
  0x13   : > { %1017 = dma.hbm_to_vmem [thread:$0]  (!%p1015_p12), %s178_s7, 1024, %s180_s9, [#allocation3], %s1183_s10, %s1183_s10, %s1184_s11  }
  0x15   : > { %1159 = dma.done.wait (%p1022_p9), [#allocation3], 1024  }
  0x16   : > { %1161 = vsyncadd (%p1022_p9), [#allocation3], 4294966272  ;;  %p235_p13 = scmp.lt.s32.totalorder %s1240_s22, 1  ;;  %v256_v0 = vld [vmem:[%s1567_s1 + $0x38] sm:$0xff]  ;;  %v255_v1 = vld [vmem:[%s1567_s1 + $0x30] sm:$0xff]  ;;  %vm257_vm0 = vcmask 523264   ;;  %v419_v55 = vlaneseq }
  0x17   : > { %293 = vmatpush.msra.mxu0 %v256_v0  ;;  %v254_v2 = vld [vmem:[%s1567_s1 + $0x28] sm:$0xff]  ;;  %v253_v3 = vld [vmem:[%s1567_s1 + $0x20] sm:$0xff]  ;;  %v252_v4 = vld [vmem:[%s1567_s1 + $0x18] sm:$0xff]  ;;  %s1185_s17 = smov 64   ;;  %vm623_vm13 = vcmask 588800   ;;  %s232_s26 = sand.u32 1, %s1172_s19  }
  0x18   : > { %s236_s23 = scalar_select %p235_p13, %s1240_s22, 1  ;;  %v251_v5 = vld [vmem:[%s1567_s1 + $0x10] sm:$0xff]  ;;  %v250_v6 = vld [vmem:[%s1567_s1 + $0x8] sm:$0xff]  ;;  %v249_v7 = vld [vmem:[%s1567_s1] sm:$0xff]  ;;  %v420_v60 = vshrl.u32 %v419_v55, 7 }
  0x19   : > { %294 = vmatpush.msra.mxu0 %v255_v1  ;;  %s1005_s30 = smul.u32 72, %s232_s26  ;;  %s853_s13 = scalar_lea.sflag [#allocation4], %s232_s26 }
  0x1a   : > { %s1006_s7 = smul.u32 72, %s236_s23 }
  0x1b   : > { %295 = vmatpush.msra.mxu0 %v254_v2  ;;  %v1351_v2 = vadd.s32 64, %v420_v60  ;;  %s234_s6 = scalar_lea.vmem [#allocation5], %s1005_s30 }
  0x1c   : > { %s239_s14 = scalar_lea.vmem %s1566_s0, %s1006_s7  ;;  %s1007_s7 = smul.u32 72, %s1240_s22 }
  0x1d   : > { %296 = vmatpush.msra.mxu0 %v253_v3  ;;  %v240_v8 = vld [vmem:[%s239_s14] sm:$0xff]  ;;  %v241_v9 = vld [vmem:[%s239_s14 + $0x8] sm:$0xff]  ;;  %v242_v10 = vld [vmem:[%s239_s14 + $0x10] sm:$0xff]  ;;  %vm437_vm1 = vcmp.lt.s32.totalorder %v1351_v2, 65  ;;  %s865_s11 = sshll.u32 %s234_s6, 4  ;;  %s866_s11 = int_to_ptr.vmem [resolvable:$true] %s865_s11 }
  0x1e   : > { %v243_v11 = vld [vmem:[%s239_s14 + $0x18] sm:$0xff]  ;;  %v244_v12 = vld [vmem:[%s239_s14 + $0x20] sm:$0xff]  ;;  %v245_v13 = vld [vmem:[%s239_s14 + $0x28] sm:$0xff]  ;;  %s864_s10 = scalar_lea.hbm %s1571_s5, %s1007_s7 }
  0x1f   : > { %297 = vmatpush.msra.mxu0 %v252_v4  ;;  %v246_v14 = vld [vmem:[%s239_s14 + $0x30] sm:$0xff]  ;;  %v247_v15 = vld [vmem:[%s239_s14 + $0x38] sm:$0xff]  ;;  %v248_v16 = vld [vmem:[%s239_s14 + $0x40] sm:$0xff]  ;;  %s867_s12 = sshll.u32 %s864_s10, 4  ;;  %s868_s12 = int_to_ptr.hbm [resolvable:$true] %s867_s12 }
  0x20   : > { %s1128_s14 = sshra.s32 %s868_s12, 4  ;;  %s1129_s14 = int_to_ptr.hbm [resolvable:$true] %s1128_s14 }
  0x21   : > { %298 = vmatpush.msra.mxu0 %v251_v5  ;;  %s1130_s15 = scalar_lea.hbm %s1129_s14, 72  ;;  %p1135_p3 = scmp.lt.s32.totalorder %s1129_s14, %s1571_s5 }
  0x22   : > { %p1131_p0 = scmp.ne.s32.totalorder %s1129_s14, %s1130_s15 }
  0x23   : > { %299 = vmatpush.msra.mxu0 %v250_v6 }
  0x24   : > { %p1132_p1 = pnand %p1131_p0, %p1257_p5 }
  0x25   : > { %300 = vmatpush.msra.mxu0 %v249_v7 }
  0x26   : > { %949 = vmatmul.msk.f32.vlgmr.msra.gmra.mxu0 %vm257_vm0, %v240_v8  ;;  %p1133_p2 = pneg %p1132_p1 }
  0x2e   : > { %950 = vmatmul.msk.f32.gmra.mxu0 %vm257_vm0, %v241_v9 }
  0x36   : > { %951 = vmatmul.msk.f32.gmra.mxu0 %vm257_vm0, %v242_v10 }
  0x3e   : > { %952 = vmatmul.msk.f32.gmra.mxu0 %vm257_vm0, %v243_v11 }
  0x46   : > { %953 = vmatmul.msk.f32.gmra.mxu0 %vm257_vm0, %v244_v12 }
  0x4e   : > { %954 = vmatmul.msk.f32.gmra.mxu0 %vm257_vm0, %v245_v13 }
  0x56   : > { %955 = vmatmul.msk.f32.gmra.mxu0 %vm257_vm0, %v246_v14 }
  0x5e   : > { %956 = vmatmul.msk.f32.gmra.mxu0 %vm257_vm0, %v247_v15 }
  0x66   : > { %957 = vmatmul.msk.f32.gmra.mxu0 %vm257_vm0, %v248_v16 }
  0xa3   : > { %v1315_v17 = vpop.f32.mrf.mxu0 }
  0xa4   : > { %v329_v18 = vmul.f32 %v1315_v17, %v1315_v17 }
  0xa6   : > { %347 = vrot.lane.b32.xlu0 %v329_v18, %s1185_s17 }
  0xab   : > { %v1319_v19 = vpop.f32.mrf.mxu0 }
  0xac   : > { %v330_v20 = vmul.f32 %v1319_v19, %v1319_v19 }
  0xae   : > { %349 = vrot.lane.b32.xlu1 %v330_v20, %s1185_s17 }
  0xb3   : > { %v1323_v21 = vpop.f32.mrf.mxu0 }
  0xb4   : > { %v331_v22 = vmul.f32 %v1323_v21, %v1323_v21 }
  0xb6   : > { %351 = vrot.lane.b32.xlu2 %v331_v22, %s1185_s17 }
  0xbb   : > { %v1327_v23 = vpop.f32.mrf.mxu0 }
  0xbc   : > { %v332_v24 = vmul.f32 %v1327_v23, %v1327_v23 }
  0xbe   : > { %353 = vrot.lane.b32.xlu2 %v332_v24, %s1185_s17 }
  0xc3   : > { %v1331_v25 = vpop.f32.mrf.mxu0 }
  0xc4   : > { %v333_v26 = vmul.f32 %v1331_v25, %v1331_v25 }
  0xc6   : > { %355 = vrot.lane.b32.xlu0 %v333_v26, %s1185_s17 }
  0xcb   : > { %v1335_v27 = vpop.f32.mrf.mxu0 }
  0xcc   : > { %v334_v28 = vmul.f32 %v1335_v27, %v1335_v27 }
  0xce   : > { %357 = vrot.lane.b32.xlu0 %v334_v28, %s1185_s17 }
  0xd3   : > { %v1339_v29 = vpop.f32.mrf.mxu0 }
  0xd4   : > { %v335_v34 = vmul.f32 %v1339_v29, %v1339_v29 }
  0xdb   : > { %v1341_v30 = vpop.f32.mrf.mxu0 }
  0xdc   : > { %v336_v31 = vmul.f32 %v1341_v30, %v1341_v30 }
  0xde   : > { %361 = vrot.lane.b32.xlu2 %v336_v31, %s1185_s17 }
  0xe3   : > { %v1345_v32 = vpop.f32.mrf.mxu0 }
  0xe4   : > { %v337_v33 = vmul.f32 %v1345_v32, %v1345_v32 }
  0xe6   : > { %363 = vrot.lane.b32.xlu1 %v337_v33, %s1185_s17 }
  0xee   : > { %359 = vrot.lane.b32.xlu1 %v335_v34, %s1185_s17  ;;  %s1134_s17 = scalar_lea.hbm %s1571_s5, 144 }
  0xef   : > { %p1136_p4 = scmp.lt.s32.totalorder %s1134_s17, %s1130_s15 }
  0xf1   : > { %p1137_p7 = por %p1136_p4, %p1135_p3 }
  0xf3   : > { %p1138_p8 = pnand %p1137_p7, %p1133_p2 }
 0x110   : > { %v352_v35 = vpop.permute.xlu2 %351 }
 0x111   : > { %v376_v39 = vadd.f32 %v352_v35, %v331_v22 }
 0x113   : > { %v385_v46 = vadd.f32 4.9303807e-32, %v376_v39 }
 0x115   : > { %1064 = vlog2.f32 %v385_v46 }
 0x118   : > { %v348_v36 = vpop.permute.xlu0 %347  ;;  %v354_v38 = vpop.permute.xlu2 %353 }
 0x119   : > { %v374_v44 = vadd.f32 %v348_v36, %v329_v18  ;;  %v377_v50 = vadd.f32 %v354_v38, %v332_v24 }
 0x11b   : > { %v383_v49 = vadd.f32 4.9303807e-32, %v374_v44  ;;  %v386_v57 = vadd.f32 4.9303807e-32, %v377_v50  ;;  %v1065_v61 = vpop.eup %1064 }
 0x11c   : > { %v397_v16 = vmul.f32 0.6931472, %v1065_v61 }
 0x120   : > { %v350_v40 = vpop.permute.xlu1 %349 }
 0x121   : > { %v375_v51 = vadd.f32 %v350_v40, %v330_v20 }
 0x123   : > { %v384_v58 = vadd.f32 4.9303807e-32, %v375_v51 }
 0x138   : > { %v356_v37 = vpop.permute.xlu0 %355  ;;  %v362_v41 = vpop.permute.xlu2 %361 }
 0x139   : > { %v378_v42 = vadd.f32 %v356_v37, %v333_v26  ;;  %v381_v45 = vadd.f32 %v362_v41, %v336_v31 }
 0x13b   : > { %v387_v48 = vadd.f32 4.9303807e-32, %v378_v42  ;;  %v390_v52 = vadd.f32 4.9303807e-32, %v381_v45 }
 0x13d   : > { %1066 = vlog2.f32 %v387_v48 }
 0x13e   : > { %1068 = vlog2.f32 %v383_v49 }
 0x13f   : > { %1070 = vlog2.f32 %v390_v52 }
 0x140   : > { %v358_v43 = vpop.permute.xlu0 %357 }
 0x141   : > { %v379_v47 = vadd.f32 %v358_v43, %v334_v28 }
 0x143   : > { %v388_v53 = vadd.f32 4.9303807e-32, %v379_v47  ;;  %v1067_v62 = vpop.eup %1066 }
 0x144   : > { %v1069_v63 = vpop.eup %1068  ;;  %v401_v5 = vmul.f32 0.6931472, %v1067_v62 }
 0x145   : > { %1072 = vlog2.f32 %v388_v53  ;;  %v1071_v1 = vpop.eup %1070  ;;  %v393_v9 = vmul.f32 0.6931472, %v1069_v63 }
 0x146   : > { %v407_v12 = vmul.f32 0.6931472, %v1071_v1  ;;  %v414_v13 = vmul.f32 4.3429446, %v401_v5 }
 0x147   : > { %v410_v20 = vmul.f32 4.3429446, %v393_v9 }
 0x148   : > { %v451_v26 = vsel %vm257_vm0, %v414_v13, -inf  ;;  %v417_v28 = vmul.f32 4.3429446, %v407_v12 }
 0x149   : > { %v447_v36 = vsel %vm257_vm0, %v410_v20, -inf }
 0x14a   : > { %v452_v40 = vmax.f32 %v447_v36, %v451_v26  ;;  %v457_v41 = vsel %vm257_vm0, %v417_v28, -inf }
 0x14b   : > { %v1073_v4 = vpop.eup %1072 }
 0x14c   : > { %v403_v14 = vmul.f32 0.6931472, %v1073_v4 }
 0x14e   : > { %v415_v31 = vmul.f32 4.3429446, %v403_v14 }
 0x150   : > { %v453_v42 = vsel %vm257_vm0, %v415_v31, -inf }
 0x158   : > { %v364_v54 = vpop.permute.xlu1 %363 }
 0x159   : > { %v382_v56 = vadd.f32 %v364_v54, %v337_v33 }
 0x15b   : > { %v391_v59 = vadd.f32 4.9303807e-32, %v382_v56 }
 0x15d   : > { %1074 = vlog2.f32 %v391_v59 }
 0x15e   : > { %1076 = vlog2.f32 %v386_v57 }
 0x15f   : > { %1078 = vlog2.f32 %v384_v58 }
 0x160   : > { %v360_v0 = vpop.permute.xlu1 %359 }
 0x161   : > { %v380_v3 = vadd.f32 %v360_v0, %v335_v34  ;;  %v412_v34 = vmul.f32 4.3429446, %v397_v16 }
 0x163   : > { %v1075_v6 = vpop.eup %1074  ;;  %v389_v7 = vadd.f32 4.9303807e-32, %v380_v3  ;;  %v449_v45 = vsel %vm257_vm0, %v412_v34, -inf }
 0x164   : > { %v1077_v8 = vpop.eup %1076  ;;  %v409_v10 = vmul.f32 0.6931472, %v1075_v6 }
 0x165   : > { %v1079_v11 = vpop.eup %1078  ;;  %1080 = vlog2.f32 %v389_v7  ;;  %v399_v18 = vmul.f32 0.6931472, %v1077_v8 }
 0x166   : > { %v418_v15 = vmul.f32 4.3429446, %v409_v10  ;;  %v395_v22 = vmul.f32 0.6931472, %v1079_v11 }
 0x167   : > { %v413_v35 = vmul.f32 4.3429446, %v399_v18 }
 0x168   : > { %v446_v24 = vsel %vm437_vm1, %v418_v15, -3e+38  ;;  %v411_v37 = vmul.f32 4.3429446, %v395_v22 }
 0x169   : > { %v459_v38 = vsel %vm257_vm0, %v446_v24, -inf  ;;  %v450_v46 = vsel %vm257_vm0, %v413_v35, -inf }
 0x16a   : > { %v460_v44 = vmax.f32 %v452_v40, %v459_v38  ;;  %v448_v47 = vsel %vm257_vm0, %v411_v37, -inf  ;;  %v458_v49 = vmax.f32 %v450_v46, %v457_v41 }
 0x16b   : > { %v1081_v33 = vpop.eup %1080  ;;  %v454_v50 = vmax.f32 %v448_v47, %v453_v42 }
 0x16c   : > { %v405_v39 = vmul.f32 0.6931472, %v1081_v33 }
 0x16d   : > { %v461_v52 = vmax.f32 %v460_v44, %v454_v50 }
 0x16e   : > { %v416_v43 = vmul.f32 4.3429446, %v405_v39 }
 0x170   : > { %v455_v48 = vsel %vm257_vm0, %v416_v43, -inf }
 0x171   : > { %v456_v51 = vmax.f32 %v449_v45, %v455_v48 }
 0x173   : > { %v462_v53 = vmax.f32 %v456_v51, %v458_v49 }
 0x175   : > { %v463_v54 = vmax.f32 %v461_v52, %v462_v53 }
 0x177   : > { %v464_v55 = vrot.slane %v463_v54, 4 }
 0x179   : > { %v465_v56 = vmax.f32 %v463_v54, %v464_v55 }
 0x17b   : > { %v466_v57 = vrot.slane %v465_v56, 2 }
 0x17d   : > { %v467_v58 = vmax.f32 %v465_v56, %v466_v57 }
 0x17f   : > { %v468_v59 = vrot.slane %v467_v58, 1 }
 0x181   : > { %v469_v60 = vmax.f32 %v467_v58, %v468_v59 }
 0x183   : > { %v958_v61 = vadd.f32 -40.0, %v469_v60 }
 0x185   : > { %v1365_v62 = vmax.f32 %v410_v20, %v958_v61  ;;  %v1367_v63 = vmax.f32 %v411_v37, %v958_v61  ;;  %v1369_v0 = vmax.f32 %v412_v34, %v958_v61  ;;  %v1371_v1 = vmax.f32 %v413_v35, %v958_v61 }
 0x186   : > { %v1377_v6 = vmax.f32 %v414_v13, %v958_v61  ;;  %v1381_v9 = vmax.f32 %v415_v31, %v958_v61  ;;  %v1385_v12 = vmax.f32 %v416_v43, %v958_v61  ;;  %v1389_v18 = vmax.f32 %v418_v15, %v958_v61 }
 0x187   : > { %v489_v3 = vsel %vm257_vm0, %v1365_v62, 0.0  ;;  %v490_v4 = vsel %vm257_vm0, %v1367_v63, 0.0  ;;  %v492_v7 = vsel %vm257_vm0, %v1369_v0, 0.0  ;;  %v494_v10 = vsel %vm257_vm0, %v1371_v1, 0.0 }
 0x188   : > { %v491_v5 = vadd.f32 %v490_v4, %v489_v3  ;;  %v496_v14 = vsel %vm257_vm0, %v1377_v6, 0.0  ;;  %v1391_v13 = vmax.f32 %v417_v28, %v958_v61  ;;  %v498_v20 = vsel %vm257_vm0, %v1381_v9, 0.0 }
 0x189   : > { %v500_v24 = vsel %vm257_vm0, %v1385_v12, 0.0  ;;  %v488_v31 = vsel %vm437_vm1, %v1389_v18, 0.0 }
 0x18a   : > { %v493_v8 = vadd.f32 %v492_v7, %v491_v5  ;;  %v502_v33 = vsel %vm257_vm0, %v1391_v13, 0.0  ;;  %v504_v15 = vsel %vm257_vm0, %v488_v31, 0.0 }
 0x18c   : > { %v495_v11 = vadd.f32 %v494_v10, %v493_v8 }
 0x18e   : > { %v497_v16 = vadd.f32 %v496_v14, %v495_v11 }
 0x190   : > { %v499_v22 = vadd.f32 %v498_v20, %v497_v16 }
 0x192   : > { %v501_v26 = vadd.f32 %v500_v24, %v499_v22 }
 0x194   : > { %v503_v34 = vadd.f32 %v502_v33, %v501_v26 }
 0x196   : > { %v505_v28 = vadd.f32 %v504_v15, %v503_v34 }
 0x198   : > { %v506_v35 = vrot.slane %v505_v28, 4 }
 0x19a   : > { %v507_v36 = vadd.f32 %v506_v35, %v505_v28 }
 0x19c   : > { %v508_v37 = vrot.slane %v507_v36, 2 }
 0x19e   : > { %v509_v38 = vadd.f32 %v508_v37, %v507_v36 }
 0x1a0   : > { %v510_v39 = vrot.slane %v509_v38, 1 }
 0x1a2   : > { %v511_v40 = vadd.f32 %v510_v39, %v509_v38 }
 0x1a4   : > { %v512_v41 = vmul.f32 0.015384615, %v511_v40 }
 0x1a6   : > { %v513_v42 = vsub.f32 %v1365_v62, %v512_v41  ;;  %v514_v43 = vsub.f32 %v1367_v63, %v512_v41  ;;  %v515_v44 = vsub.f32 %v1369_v0, %v512_v41  ;;  %v516_v45 = vsub.f32 %v1371_v1, %v512_v41 }
 0x1a7   : > { %v517_v46 = vsub.f32 %v1377_v6, %v512_v41  ;;  %v518_v50 = vsub.f32 %v1381_v9, %v512_v41  ;;  %v519_v55 = vsub.f32 %v1385_v12, %v512_v41  ;;  %v521_v58 = vsub.f32 %v1389_v18, %v512_v41 }
 0x1a8   : > { %v531_v47 = vmul.f32 %v513_v42, %v513_v42  ;;  %v532_v48 = vmul.f32 %v514_v43, %v514_v43  ;;  %v533_v49 = vmul.f32 %v515_v44, %v515_v44  ;;  %v534_v51 = vmul.f32 %v516_v45, %v516_v45 }
 0x1a9   : > { %v535_v56 = vmul.f32 %v517_v46, %v517_v46  ;;  %v520_v60 = vsub.f32 %v1391_v13, %v512_v41  ;;  %v536_v61 = vmul.f32 %v518_v50, %v518_v50  ;;  %v537_v5 = vmul.f32 %v519_v55, %v519_v55 }
 0x1aa   : > { %v540_v52 = vsel %vm257_vm0, %v531_v47, 0.0  ;;  %v541_v53 = vsel %vm257_vm0, %v532_v48, 0.0  ;;  %v543_v57 = vsel %vm257_vm0, %v533_v49, 0.0  ;;  %v545_v3 = vsel %vm257_vm0, %v534_v51, 0.0 }
 0x1ab   : > { %v542_v54 = vadd.f32 %v541_v53, %v540_v52  ;;  %v547_v7 = vsel %vm257_vm0, %v535_v56, 0.0  ;;  %v530_v8 = vsel %vm437_vm1, %v521_v58, 0.0  ;;  %v538_v11 = vmul.f32 %v520_v60, %v520_v60 }
 0x1ac   : > { %v549_v14 = vsel %vm257_vm0, %v536_v61, 0.0  ;;  %v539_v20 = vmul.f32 %v530_v8, %v530_v8  ;;  %v551_v22 = vsel %vm257_vm0, %v537_v5, 0.0  ;;  %v1186_v52 = vmov 0.0  }
 0x1ad   : > { %v544_v59 = vadd.f32 %v543_v57, %v542_v54  ;;  %v553_v26 = vsel %vm257_vm0, %v538_v11, 0.0 }
 0x1ae   : > { %v555_v33 = vsel %vm257_vm0, %v539_v20, 0.0  ;;  %v614_v20 = vld [vmem:[%s1568_s2] sm:$0xff] }
 0x1af   : > { %v546_v4 = vadd.f32 %v545_v3, %v544_v59 }
 0x1b1   : > { %v548_v10 = vadd.f32 %v547_v7, %v546_v4 }
 0x1b3   : > { %v550_v16 = vadd.f32 %v549_v14, %v548_v10 }
 0x1b5   : > { %v552_v24 = vadd.f32 %v551_v22, %v550_v16  ;;  %v616_v22 = vld [vmem:[%s1568_s2 + $0x10] sm:$0xff] }
 0x1b7   : > { %v554_v31 = vadd.f32 %v553_v26, %v552_v24  ;;  %v617_v24 = vld [vmem:[%s1568_s2 + $0x18] sm:$0xff]  ;;  %v618_v26 = vld [vmem:[%s1568_s2 + $0x20] sm:$0xff] }
 0x1b9   : > { %v556_v34 = vadd.f32 %v555_v33, %v554_v31  ;;  %v702_v31 = vld [vmem:[#allocation2 + $0x38] sm:$0xff]  ;;  %v701_v33 = vld [vmem:[#allocation2 + $0x30] sm:$0xff] }
 0x1ba   : > { %738 = vmatpush.msra.mxu2 %v702_v31 }
 0x1bb   : > { %v557_v15 = vrot.slane %v556_v34, 4 }
 0x1bc   : > { %739 = vmatpush.msra.mxu2 %v701_v33 }
 0x1bd   : > { %v558_v28 = vadd.f32 %v557_v15, %v556_v34  ;;  %v700_v34 = vld [vmem:[#allocation2 + $0x28] sm:$0xff]  ;;  %v699_v15 = vld [vmem:[#allocation2 + $0x20] sm:$0xff] }
 0x1be   : > { %740 = vmatpush.msra.mxu2 %v700_v34 }
 0x1bf   : > { %v559_v35 = vrot.slane %v558_v28, 2 }
 0x1c0   : > { %741 = vmatpush.msra.mxu2 %v699_v15 }
 0x1c1   : > { %v560_v2 = vadd.f32 %v559_v35, %v558_v28  ;;  %v619_v28 = vld [vmem:[%s1568_s2 + $0x28] sm:$0xff]  ;;  %v698_v35 = vld [vmem:[#allocation2 + $0x18] sm:$0xff] }
 0x1c2   : > { %742 = vmatpush.msra.mxu2 %v698_v35 }
 0x1c3   : > { %v561_v36 = vrot.slane %v560_v2, 1 }
 0x1c5   : > { %v562_v37 = vadd.f32 %v561_v36, %v560_v2  ;;  %v697_v2 = vld [vmem:[#allocation2 + $0x10] sm:$0xff]  ;;  %v696_v36 = vld [vmem:[#allocation2 + $0x8] sm:$0xff] }
 0x1c6   : > { %743 = vmatpush.msra.mxu2 %v697_v2 }
 0x1c7   : > { %v563_v38 = vmul.f32 0.015625, %v562_v37  ;;  %v620_v37 = vld [vmem:[%s1568_s2 + $0x30] sm:$0xff] }
 0x1c8   : > { %744 = vmatpush.msra.mxu2 %v696_v36 }
 0x1c9   : > { %1082 = vrsqrt.f32 %v563_v38  ;;  %vm571_vm2 = vcmp.eq.f32.partialorder %v563_v38, inf  ;;  %v574_v47 = vand.u32 2147483648, %v563_v38  ;;  %vm573_vm3 = vcmp.eq.f32.partialorder %v563_v38, 0.0 }
 0x1cf   : > { %v1083_v39 = vpop.eup %1082 }
 0x1d0   : > { %v565_v40 = vmul.f32 %v1083_v39, %v563_v38 }
 0x1d2   : > { %v566_v42 = vmul.f32 %v1083_v39, %v565_v40  ;;  %v695_v40 = vld [vmem:[#allocation2] sm:$0xff] }
 0x1d3   : > { %745 = vmatpush.msra.mxu2 %v695_v40 }
 0x1d4   : > { %v567_v43 = vmul.f32 0.5, %v566_v42 }
 0x1d6   : > { %v568_v44 = vsub.f32 1.5, %v567_v43 }
 0x1d8   : > { %v569_v45 = vmul.f32 %v1083_v39, %v568_v44  ;;  %v622_v39 = vld [vmem:[%s1568_s2 + $0x40] sm:$0xff] }
 0x1da   : > { %v570_v46 = vmul.f32 %v569_v45, %v563_v38 }
 0x1dc   : > { %v572_v48 = vsel %vm571_vm2, %v563_v38, %v570_v46  ;;  %v621_v38 = vld [vmem:[%s1568_s2 + $0x38] sm:$0xff] }
 0x1dd   : > { %v575_v49 = vsel %vm573_vm3, %v574_v47, %v572_v48  ;;  %v798_v47 = vld [vmem:[%s1570_s4 + $0x78] sm:$0xff]  ;;  %v797_v48 = vld [vmem:[%s1570_s4 + $0x70] sm:$0xff] }
 0x1de   : > { %v576_v50 = vmul.f32 1.5, %v575_v49  ;;  %799 = vmatpush.msrb.mxu0 %v798_v47  ;;  %989 = vmatpush.msra.mxu3 %v798_v47  ;;  %v796_v49 = vld [vmem:[%s1570_s4 + $0x68] sm:$0xff] }
 0x1e0   : > { %v577_v51 = vadd.f32 %v576_v50, %v512_v41  ;;  %800 = vmatpush.msrb.mxu0 %v797_v48  ;;  %990 = vmatpush.msra.mxu3 %v797_v48  ;;  %v795_v50 = vld [vmem:[%s1570_s4 + $0x60] sm:$0xff] }
 0x1e2   : > { %vm586_vm4 = vcmp.gt.f32.partialorder %v1389_v18, %v577_v51  ;;  %vm585_vm5 = vcmp.gt.f32.partialorder %v1391_v13, %v577_v51  ;;  %vm584_vm6 = vcmp.gt.f32.partialorder %v1385_v12, %v577_v51  ;;  %vm583_vm7 = vcmp.gt.f32.partialorder %v1381_v9, %v577_v51  ;;  %801 = vmatpush.msrb.mxu0 %v796_v49 }
 0x1e3   : > { %v595_v53 = vsel %vm586_vm4, 1.0, %v1186_v52  ;;  %v594_v54 = vsel %vm585_vm5, 1.0, %v1186_v52  ;;  %v593_v55 = vsel %vm584_vm6, 1.0, %v1186_v52  ;;  %v592_v58 = vsel %vm583_vm7, 1.0, %v1186_v52  ;;  %991 = vmatpush.msra.mxu3 %v796_v49 }
 0x1e4   : > { %v967_v56 = vadd.f32 -1.0, %v595_v53  ;;  %v966_v57 = vadd.f32 -1.0, %v594_v54  ;;  %vm582_vm8 = vcmp.gt.f32.partialorder %v1377_v6, %v577_v51  ;;  %v965_v60 = vadd.f32 -1.0, %v593_v55  ;;  %802 = vmatpush.msrb.mxu0 %v795_v50  ;;  %v793_v53 = vld [vmem:[%s1570_s4 + $0x50] sm:$0xff]  ;;  %v792_v54 = vld [vmem:[%s1570_s4 + $0x48] sm:$0xff]  ;;  %v791_v55 = vld [vmem:[%s1570_s4 + $0x40] sm:$0xff] }
 0x1e5   : > { %vm581_vm9 = vcmp.gt.f32.partialorder %v1371_v1, %v577_v51  ;;  %v591_v18 = vsel %vm582_vm8, 1.0, %v1186_v52  ;;  %v964_v41 = vadd.f32 -1.0, %v592_v58  ;;  %vm580_vm10 = vcmp.gt.f32.partialorder %v1369_v0, %v577_v51  ;;  %992 = vmatpush.msra.mxu3 %v795_v50  ;;  %v789_v58 = vld [vmem:[%s1570_s4 + $0x30] sm:$0xff] }
 0x1e6   : > { %v613_v59 = vadd.f32 1.0, %v967_v56  ;;  %v612_v13 = vadd.f32 1.0, %v966_v57  ;;  %v590_v9 = vsel %vm581_vm9, 1.0, %v1186_v52  ;;  %v611_v12 = vadd.f32 1.0, %v965_v60  ;;  %v790_v56 = vld [vmem:[%s1570_s4 + $0x38] sm:$0xff]  ;;  %v787_v60 = vld [vmem:[%s1570_s4 + $0x20] sm:$0xff] }
 0x1e7   : > { %v963_v61 = vadd.f32 -1.0, %v591_v18  ;;  %vm579_vm11 = vcmp.gt.f32.partialorder %v1367_v63, %v577_v51  ;;  %v589_v3 = vsel %vm580_vm10, 1.0, %v1186_v52  ;;  %v610_v4 = vadd.f32 1.0, %v964_v41  ;;  %v786_v18 = vld [vmem:[%s1570_s4 + $0x18] sm:$0xff]  ;;  %v785_v41 = vld [vmem:[%s1570_s4 + $0x10] sm:$0xff] }
 0x1e8   : > { %658 = vmatpush.msra.mxu1 %v613_v59  ;;  %v962_v6 = vadd.f32 -1.0, %v590_v9  ;;  %vm578_vm12 = vcmp.gt.f32.partialorder %v1365_v62, %v577_v51  ;;  %v588_v5 = vsel %vm579_vm11, 1.0, %v1186_v52  ;;  %v961_v7 = vadd.f32 -1.0, %v589_v3  ;;  %v615_v62 = vld [vmem:[%s1568_s2 + $0x8] sm:$0xff]  ;;  %v794_v51 = vld [vmem:[%s1570_s4 + $0x58] sm:$0xff] }
 0x1e9   : > { %v609_v1 = vadd.f32 1.0, %v963_v61  ;;  %v587_v8 = vsel %vm578_vm12, 1.0, %v1186_v52  ;;  %v960_v0 = vadd.f32 -1.0, %v588_v5  ;;  %803 = vmatpush.msrb.mxu0 %v794_v51  ;;  %993 = vmatpush.msra.mxu3 %v794_v51  ;;  %v788_v59 = vld [vmem:[%s1570_s4 + $0x28] sm:$0xff]  ;;  %v783_v61 = vld [vmem:[%s1570_s4] sm:$0xff] }
 0x1ea   : > { %659 = vmatpush.msra.mxu1 %v612_v13  ;;  %v608_v10 = vadd.f32 1.0, %v962_v6  ;;  %v607_v11 = vadd.f32 1.0, %v961_v7  ;;  %v959_v14 = vadd.f32 -1.0, %v587_v8 }
 0x1eb   : > { %v606_v16 = vadd.f32 1.0, %v960_v0  ;;  %804 = vmatpush.msrb.mxu0 %v793_v53  ;;  %994 = vmatpush.msra.mxu3 %v793_v53 }
 0x1ec   : > { %660 = vmatpush.msra.mxu1 %v611_v12  ;;  %v605_v63 = vadd.f32 1.0, %v959_v14  ;;  %v784_v12 = vld [vmem:[%s1570_s4 + $0x8] sm:$0xff] }
 0x1ed   : > { %805 = vmatpush.msrb.mxu0 %v792_v54  ;;  %995 = vmatpush.msra.mxu3 %v792_v54 }
 0x1ee   : > { %661 = vmatpush.msra.mxu1 %v610_v4 }
 0x1ef   : > { %806 = vmatpush.msrb.mxu0 %v791_v55  ;;  %996 = vmatpush.msra.mxu3 %v791_v55 }
 0x1f0   : > { %662 = vmatpush.msra.mxu1 %v609_v1 }
 0x1f1   : > { %807 = vmatpush.msrb.mxu0 %v790_v56  ;;  %997 = vmatpush.msra.mxu3 %v790_v56 }
 0x1f2   : > { %663 = vmatpush.msra.mxu1 %v608_v10 }
 0x1f3   : > { %808 = vmatpush.msrb.mxu0 %v789_v58  ;;  %998 = vmatpush.msra.mxu3 %v789_v58 }
 0x1f4   : > { %664 = vmatpush.msra.mxu1 %v607_v11 }
 0x1f5   : > { %809 = vmatpush.msrb.mxu0 %v788_v59  ;;  %999 = vmatpush.msra.mxu3 %v788_v59 }
 0x1f6   : > { %665 = vmatpush.msra.mxu1 %v606_v16 }
 0x1f7   : > { %810 = vmatpush.msrb.mxu0 %v787_v60  ;;  %1000 = vmatpush.msra.mxu3 %v787_v60 }
 0x1f8   : > { %666 = vmatpush.msra.mxu1 %v605_v63 }
 0x1f9   : > { %968 = vmatmul.msk.f32.vlgmr.msra.gmra.mxu1 %vm623_vm13, %v614_v20  ;;  %811 = vmatpush.msrb.mxu0 %v786_v18 }
 0x1fa   : > { %1001 = vmatpush.msra.mxu3 %v786_v18 }
 0x1fb   : > { %812 = vmatpush.msrb.mxu0 %v785_v41 }
 0x1fc   : > { %1002 = vmatpush.msra.mxu3 %v785_v41 }
 0x1fd   : > { %813 = vmatpush.msrb.mxu0 %v784_v12 }
 0x1fe   : > { %1003 = vmatpush.msra.mxu3 %v784_v12 }
 0x1ff   : > { %814 = vmatpush.msrb.mxu0 %v783_v61 }
 0x200   : > { %1004 = vmatpush.msra.mxu3 %v783_v61 }
 0x201   : > { %969 = vmatmul.msk.f32.gmra.mxu1 %vm623_vm13, %v615_v62 }
 0x209   : > { %970 = vmatmul.msk.f32.gmra.mxu1 %vm623_vm13, %v616_v22 }
 0x211   : > { %971 = vmatmul.msk.f32.gmra.mxu1 %vm623_vm13, %v617_v24 }
 0x219   : > { %972 = vmatmul.msk.f32.gmra.mxu1 %vm623_vm13, %v618_v26 }
 0x221   : > { %973 = vmatmul.msk.f32.gmra.mxu1 %vm623_vm13, %v619_v28 }
 0x229   : > { %974 = vmatmul.msk.f32.gmra.mxu1 %vm623_vm13, %v620_v37 }
 0x231   : > { %975 = vmatmul.msk.f32.gmra.mxu1 %vm623_vm13, %v621_v38 }
 0x239   : > { %976 = vmatmul.msk.f32.gmra.mxu1 %vm623_vm13, %v622_v39 }
 0x276   : > { %v668_v42 = vpop.f32.mrf.mxu1 }
 0x277   : > { %977 = vmatmul.msk.f32.vlgmr.msra.gmra.mxu2 %vm257_vm0, %v668_v42 }
 0x27e   : > { %v671_v43 = vpop.f32.mrf.mxu1 }
 0x27f   : > { %978 = vmatmul.msk.f32.gmra.mxu2 %vm257_vm0, %v671_v43 }
 0x286   : > { %v674_v44 = vpop.f32.mrf.mxu1 }
 0x287   : > { %979 = vmatmul.msk.f32.gmra.mxu2 %vm257_vm0, %v674_v44 }
 0x28e   : > { %v677_v45 = vpop.f32.mrf.mxu1 }
 0x28f   : > { %980 = vmatmul.msk.f32.gmra.mxu2 %vm257_vm0, %v677_v45 }
 0x296   : > { %v680_v46 = vpop.f32.mrf.mxu1 }
 0x297   : > { %981 = vmatmul.msk.f32.gmra.mxu2 %vm257_vm0, %v680_v46 }
 0x29e   : > { %v683_v52 = vpop.f32.mrf.mxu1 }
 0x29f   : > { %982 = vmatmul.msk.f32.gmra.mxu2 %vm257_vm0, %v683_v52 }
 0x2a6   : > { %v686_v57 = vpop.f32.mrf.mxu1 }
 0x2a7   : > { %983 = vmatmul.msk.f32.gmra.mxu2 %vm257_vm0, %v686_v57 }
 0x2ae   : > { %v689_v13 = vpop.f32.mrf.mxu1 }
 0x2af   : > { %984 = vmatmul.msk.f32.gmra.mxu2 %vm257_vm0, %v689_v13 }
 0x2b6   : > { %v692_v9 = vpop.f32.mrf.mxu1 }
 0x2b7   : > { %985 = vmatmul.msk.f32.gmra.mxu2 %vm257_vm0, %v692_v9 }
 0x2fa   : > { %v747_v3 = vpop.f32.mrf.mxu2 }
 0x2fb   : > { %v774_v4 = vmul.f32 %v747_v3, %v1315_v17 }
 0x2fd   : > { %815 = vmatmul.f32.vlgmr.msrb.gmra.mxu0 %v774_v4 }
 0x302   : > { %v750_v6 = vpop.f32.mrf.mxu2 }
 0x303   : > { %v775_v5 = vmul.f32 %v750_v6, %v1319_v19 }
 0x305   : > { %818 = vmatmul.f32.vlgmr.msra.gmra.mxu3 %v775_v5 }
 0x30a   : > { %v753_v1 = vpop.f32.mrf.mxu2 }
 0x30b   : > { %v776_v7 = vmul.f32 %v753_v1, %v1323_v21 }
 0x30d   : > { %821 = vmatmul.f32.gmra.mxu3 %v776_v7 }
 0x312   : > { %v756_v8 = vpop.f32.mrf.mxu2 }
 0x313   : > { %v777_v10 = vmul.f32 %v756_v8, %v1327_v23 }
 0x315   : > { %824 = vmatmul.f32.gmra.mxu3 %v777_v10 }
 0x31a   : > { %v759_v0 = vpop.f32.mrf.mxu2 }
 0x31b   : > { %v778_v11 = vmul.f32 %v759_v0, %v1331_v25 }
 0x31d   : > { %827 = vmatmul.f32.gmra.mxu3 %v778_v11 }
 0x322   : > { %v762_v14 = vpop.f32.mrf.mxu2 }
 0x323   : > { %v779_v17 = vmul.f32 %v762_v14, %v1335_v27 }
 0x325   : > { %830 = vmatmul.f32.gmra.mxu3 %v779_v17 }
 0x32a   : > { %v765_v16 = vpop.f32.mrf.mxu2 }
 0x32b   : > { %v780_v19 = vmul.f32 %v765_v16, %v1339_v29 }
 0x32d   : > { %833 = vmatmul.f32.gmra.mxu3 %v780_v19 }
 0x332   : > { %v768_v63 = vpop.f32.mrf.mxu2 }
 0x333   : > { %v781_v21 = vmul.f32 %v768_v63, %v1341_v30 }
 0x335   : > { %836 = vmatmul.f32.gmra.mxu3 %v781_v21 }
 0x33a   : > { %v771_v20 = vpop.f32.mrf.mxu2 }
 0x33b   : > { %v782_v23 = vmul.f32 %v771_v20, %v1345_v32 }
 0x33d   : > { %839 = vmatmul.f32.gmra.mxu3 %v782_v23 }
 0x37a   : > { %v816_v25 = vpop.f32.mrf.mxu0 }
 0x37b   : > { %843 = vst [vmem:[%s234_s6] sm:$0xff] %v816_v25 }
 0x388   : > { %v819_v27 = vpop.f32.mrf.mxu3 }
 0x389   : > { %844 = vst [vmem:[%s234_s6 + $0x8] sm:$0xff] %v819_v27 }
 0x390   : > { %v822_v62 = vpop.f32.mrf.mxu3 }
 0x391   : > { %845 = vst [vmem:[%s234_s6 + $0x10] sm:$0xff] %v822_v62 }
 0x398   : > { %v825_v29 = vpop.f32.mrf.mxu3 }
 0x399   : > { %846 = vst [vmem:[%s234_s6 + $0x18] sm:$0xff] %v825_v29 }
 0x3a0   : > { %v828_v22 = vpop.f32.mrf.mxu3 }
 0x3a1   : > { %847 = vst [vmem:[%s234_s6 + $0x20] sm:$0xff] %v828_v22 }
 0x3a8   : > { %v831_v30 = vpop.f32.mrf.mxu3 }
 0x3a9   : > { %848 = vst [vmem:[%s234_s6 + $0x28] sm:$0xff] %v831_v30 }
 0x3b0   : > { %v834_v24 = vpop.f32.mrf.mxu3 }
 0x3b1   : > { %849 = vst [vmem:[%s234_s6 + $0x30] sm:$0xff] %v834_v24 }
 0x3b8   : > { %v837_v32 = vpop.f32.mrf.mxu3 }
 0x3b9   : > { %850 = vst [vmem:[%s234_s6 + $0x38] sm:$0xff] %v837_v32 }
 0x3c0   : > { %v840_v26 = vpop.f32.mrf.mxu3 }
 0x3c1   : > { %851 = vst [vmem:[%s234_s6 + $0x40] sm:$0xff] %v840_v26 }
 0x3c2   : > { %1141 = shalt.err (!%p1138_p8)
}
 0x3c3   : > { %s1187_s26 = smov 128   ;;  %s1188_s30 = smov 8  }
 0x3c4   : > { %1012 = dma.vmem_to_hbm [thread:$0]  (%p1257_p5), %s866_s11, 1152, %s868_s12, %s853_s13, %s1187_s26, %s1187_s26, %s1188_s30  }
 0x3c5 PF: > { %p1024_p9 = scmp.ge.s32.totalorder %s1180_s21, 2  ;;  %s882_s6 = sand.u32 1, %s1168_s18  }
 0x3c6   : > { %s883_s7 = scalar_lea.sflag [#allocation4], %s882_s6 }
 0x3c7   : > { %p1019_p10 = pnand %p1024_p9, %p1261_p6 }
 0x3c9   : > { %p1020_p11 = pneg %p1019_p10 }
 0x3cb   : > { %1163 = dma.done.wait (%p1020_p11), %s883_s7, 1152  }
 0x3cc   : > { %1165 = vsyncadd (%p1020_p11), %s883_s7, 4294966144  ;;  %p16_p12 = scmp.ge.s32.totalorder %s1244_s24, 4   ;;  %s1574_s18 = smov %s1172_s19 }
 0x3cd   : > { %s1575_s19 = smov %s1176_s20  ;;  %s1576_s20 = smov %s1255_s27 }
 0x3ce   : > { %s1577_s21 = smov %s1244_s24  ;;  %18 = sbr.rel (!%p16_p12) target bundleno = 4 (0x4), region = 80 }
 0x3d3   :  { %889 = vsyncpa [#allocation3], 1 }
 0x3d4   :  { %891 = vsyncpa [#allocation3 + $0x1], 1 }
 0x3d5   :  { %892 = vsyncpa [#allocation4], 1 }
 0x3d6   :  { %894 = vsyncpa [#allocation4 + $0x1], 1 }

</bundles_post_ra>
